<compile_context>
chip_gen: v7x
topology: tpu7x:2x2x1
jax: 0.10.0
libtpu: 0.0.40
codegen_flags: <defaults>
</compile_context>

<pallas_src>
import math

import jax
import jax.numpy as jnp
import numpy as np
from jax.experimental import pallas as pl
from jax.experimental.pallas import tpu as pltpu


def _pick_batch_tile(B, per_batch_bytes, target_bytes):
    """Pick the per-block batch count bt and the grid length.

    Aims for ~target_bytes per streamed block (amortizes the ~0.35 us/step
    overhead and short DMAs), keeps >= 2 grid steps when B >= 2 (so both v7x
    TensorCores get work and in/out DMAs can pipeline), and prefers an exact
    divisor of B.  Falls back to a ragged final block only when every divisor
    would give blocks < 1/4 of the target (e.g. prime B) -- it never collapses
    to bt = 1 on that account.
    """
    bt = int(max(1, min(B, target_bytes // max(per_batch_bytes, 1))))
    if bt >= B and B >= 2:
        bt = (B + 1) // 2                      # keep >= 2 grid steps
    best_div = max(d for d in range(1, bt + 1) if B % d == 0)
    if best_div * 4 > bt:                      # divisor within 4x of target -> dense blocks
        bt = best_div
    grid_len = pl.cdiv(B, bt)
    return bt, grid_len


def _make_attention_kernel(inv_hw):
    """Fused kernel for one (bt, C, HW) block. inv_hw = 1 / (H*W)."""
    inv_hw = float(inv_hw)

    def kernel(x_ref, convT_ref, fcwT_ref, fcb_ref, mixf_ref, o_ref):
        mf = mixf_ref[0]                                   # sigmoid(w), precomputed in wrapper

        # AdaptiveAvgPool2d(1) for the whole block at once: (bt, C, HW) -> (bt, C).
        pooled = jnp.sum(x_ref[...].astype(jnp.float32), axis=-1) * inv_hw

        # conv1d over channels (banded matrix) and 1x1-conv FC (+bias), batched over bt.
        x1 = jnp.dot(pooled, convT_ref[...], preferred_element_type=jnp.float32)              # (bt, C)
        x2 = jnp.dot(pooled, fcwT_ref[...], preferred_element_type=jnp.float32) + fcb_ref[...]  # (bt, C)

        # sum(matmul(x1, x2^T), dim=1) == sum(x1) * x2 ; symmetric for out2.
        s1 = jnp.sum(x1, axis=-1, keepdims=True)           # (bt, 1)
        s2 = jnp.sum(x2, axis=-1, keepdims=True)           # (bt, 1)
        out1 = jax.nn.sigmoid(s1 * x2)
        out2 = jax.nn.sigmoid(s2 * x1)
        gate = jax.nn.sigmoid(out1 * mf + out2 * (1.0 - mf))             # (bt, C)

        # Dominant write path: one lane-dense elementwise store.  x_ref is
        # re-indexed here (VMEM reads are cheap) instead of holding the slab
        # live across the gate math.
        o_ref[...] = x_ref[...] * gate.astype(o_ref.dtype)[:, :, None]

    return kernel


def attention_forward(x_nchw, conv_mat, fc_w, fc_b, mix_w, *, block_bytes_target=4 << 20):
    """x_nchw: (B, C, H, W). Returns (B, C, H, W) with the same dtype."""
    B, C, H, W = x_nchw.shape
    HW = H * W

    # (B, C, H, W) -> (B, C, H*W): collapsing contiguous trailing dims is free
    # (no HBM pass).  No lane padding: if HW % 128 != 0 only the tail lane-tile
    # store is masked, which is far cheaper than wrapper pad + slice passes.
    x_flat = x_nchw.reshape(B, C, HW)

    per_batch_bytes = C * HW * x_flat.dtype.itemsize
    bt, grid_len = _pick_batch_tile(B, per_batch_bytes, block_bytes_target)
    block_bytes = bt * per_batch_bytes

    # Pre-transposed weights (plain (bt,C)@(C,C) matmuls in-kernel, no per-step
    # transposes) and pre-sigmoided mix factor (one transcendental total).
    conv_t = conv_mat.astype(jnp.float32).T
    fc_wt = fc_w.astype(jnp.float32).T
    fc_b_row = fc_b.reshape(1, C).astype(jnp.float32)
    mix_factor = jax.nn.sigmoid(mix_w.astype(jnp.float32).reshape(1))

    # VMEM budget: 2 double-buffered input blocks + 2 output blocks + tiny
    # weights.  Cap keeps headroom on v7x (64 MiB physical VMEM); v5e's 16 MiB
    # scoped default is raised explicitly.
    vmem_limit = int(min(48 << 20, max(32 << 20, 4 * block_bytes + (8 << 20))))

    kernel = _make_attention_kernel(1.0 / HW)

    out_flat = pl.pallas_call(
        kernel,
        out_shape=jax.ShapeDtypeStruct((B, C, HW), x_flat.dtype),
        grid_spec=pltpu.PrefetchScalarGridSpec(
            num_scalar_prefetch=0,
            grid=(grid_len,),
            in_specs=[
                pl.BlockSpec((bt, C, HW), lambda i: (i, 0, 0)),
                pl.BlockSpec((C, C), lambda i: (0, 0)),
                pl.BlockSpec((C, C), lambda i: (0, 0)),
                pl.BlockSpec((1, C), lambda i: (0, 0)),
                pl.BlockSpec(memory_space=pltpu.MemorySpace.SMEM),
            ],
            out_specs=pl.BlockSpec((bt, C, HW), lambda i: (i, 0, 0)),
        ),
        compiler_params=pltpu.CompilerParams(
            dimension_semantics=("parallel",),
            vmem_limit_bytes=vmem_limit,
        ),
    )(x_flat, conv_t, fc_wt, fc_b_row, mix_factor)

    return out_flat.reshape(B, C, H, W)


def make_conv1d_band_matrix(w1, C, k):
    """Turn the (k,) Conv1d(1,1,k, padding=k//2, bias=False) weight into an
    equivalent dense (C, C) banded matrix (host-side parameter glue)."""
    pad = k // 2
    i_idx = jnp.arange(C)[:, None]
    j_idx = jnp.arange(C)[None, :]
    u = j_idx - i_idx + pad
    mask = (u >= 0) & (u < k)
    return jnp.where(mask, w1[jnp.clip(u, 0, k - 1)], 0.0).astype(jnp.float32)


def reference_forward(x, conv_mat, fc_w, fc_b, mix_w):
    """Pure-JAX reference mirroring the PyTorch forward, for verification."""
    pooled = jnp.mean(x, axis=(2, 3))                      # (B, C)
    x1 = pooled @ conv_mat.T                               # (B, C)
    x2 = pooled @ fc_w.T + fc_b[None, :]                   # (B, C)
    s1 = jnp.sum(x1, axis=1, keepdims=True)
    s2 = jnp.sum(x2, axis=1, keepdims=True)
    out1 = jax.nn.sigmoid(s1 * x2)
    out2 = jax.nn.sigmoid(s2 * x1)
    mf = jax.nn.sigmoid(mix_w[0])
    out = jax.nn.sigmoid(out1 * mf + out2 * (1.0 - mf))
    return x * out[:, :, None, None]


if __name__ == "__main__":
    B, C, H, W = 2, 8, 16, 16
    b_param, gamma = 1, 2

    # kernel size from the ECA formula in __init__ (C=8 -> t=2 -> k=3, padding=1)
    t = int(abs((math.log(C, 2) + b_param) / gamma))
    k = t if t % 2 else t + 1

    key = jax.random.PRNGKey(0)
    k0, k1, k2, k3 = jax.random.split(key, 4)

    # deterministic synthetic parameters (shapes from the nn.Module __init__)
    conv1_w = jax.random.normal(k1, (k,), dtype=jnp.float32) * 0.5
    fc_w = jax.random.normal(k2, (C, C), dtype=jnp.float32) * (1.0 / math.sqrt(C))
    fc_b = jax.random.normal(k3, (C,), dtype=jnp.float32) * 0.1
    mix_w = jnp.array([-0.8], dtype=jnp.float32)

    conv_mat = make_conv1d_band_matrix(conv1_w, C, k)      # (C, C) banded matrix

    x = jax.random.normal(k0, (B, C, H, W), dtype=jnp.float32)

    y_ref = reference_forward(x, conv_mat, fc_w, fc_b, mix_w)

    y = attention_forward(x, conv_mat, fc_w, fc_b, mix_w)
    y = jax.block_until_ready(y)

    np.testing.assert_allclose(np.asarray(y), np.asarray(y_ref), rtol=1e-5, atol=1e-5)

    print("KERNEL_OK")
</pallas_src>

<mosaic_0001>
module attributes {stable_mosaic.version = 11 : i64} {
  func.func @kernel(%arg0: i32, %arg1: memref<1x8x256xf32, #tpu.memory_space<vmem>>, %arg2: memref<8x8xf32, #tpu.memory_space<vmem>>, %arg3: memref<8x8xf32, #tpu.memory_space<vmem>>, %arg4: memref<1x8xf32, #tpu.memory_space<vmem>>, %arg5: memref<1xf32, #tpu.memory_space<smem>>, %arg6: memref<1x8x256xf32, #tpu.memory_space<vmem>>) attributes {dimension_semantics = [#tpu.dimension_semantics<parallel>], iteration_bounds = array<i64: 2>, scalar_prefetch = 0 : i64, scratch_operands = 0 : i64, tpu.core_type = #tpu.core_type<tc>, window_params = [{transform_indices = @transform_0, window_bounds = array<i64: 1, 8, 256>}, {pipeline_mode = #tpu.pipeline_mode<synchronous>, transform_indices = @transform_1, window_bounds = array<i64: 8, 8>}, {pipeline_mode = #tpu.pipeline_mode<synchronous>, transform_indices = @transform_2, window_bounds = array<i64: 8, 8>}, {pipeline_mode = #tpu.pipeline_mode<synchronous>, transform_indices = @transform_3, window_bounds = array<i64: 1, 8>}, {transform_indices = @transform_4, window_bounds = array<i64: 1>}, {transform_indices = @transform_5, window_bounds = array<i64: 1, 8, 256>}]} {
    %c0 = arith.constant 0 : index
    %0 = memref.load %arg5[%c0] : memref<1xf32, #tpu.memory_space<smem>>
    %c0_0 = arith.constant 0 : index
    %c0_1 = arith.constant 0 : index
    %c0_2 = arith.constant 0 : index
    %1 = vector.load %arg1[%c0_0, %c0_1, %c0_2] : memref<1x8x256xf32, #tpu.memory_space<vmem>>, vector<1x8x256xf32>
    %cst = arith.constant dense<0.000000e+00> : vector<1x8xf32>
    %2 = vector.multi_reduction <add>, %1, %cst [2] : vector<1x8x256xf32> to vector<1x8xf32>
    %cst_3 = arith.constant 3.906250e-03 : f32
    %3 = vector.broadcast %cst_3 : f32 to vector<1x8xf32>
    %4 = arith.mulf %2, %3 : vector<1x8xf32>
    %c0_4 = arith.constant 0 : index
    %c0_5 = arith.constant 0 : index
    %5 = vector.load %arg2[%c0_4, %c0_5] : memref<8x8xf32, #tpu.memory_space<vmem>>, vector<8x8xf32>
    %cst_6 = arith.constant dense<0.000000e+00> : vector<1x8xf32>
    %6 = tpu.matmul %4, %5, %cst_6 {dimension_numbers = #tpu.dot_dimension_numbers<[1], [0], [0], [1], [0, 0, 1, 1], [], []>} : vector<1x8xf32>, vector<8x8xf32>, vector<1x8xf32> -> vector<1x8xf32>
    %c0_7 = arith.constant 0 : index
    %c0_8 = arith.constant 0 : index
    %7 = vector.load %arg3[%c0_7, %c0_8] : memref<8x8xf32, #tpu.memory_space<vmem>>, vector<8x8xf32>
    %cst_9 = arith.constant dense<0.000000e+00> : vector<1x8xf32>
    %8 = tpu.matmul %4, %7, %cst_9 {dimension_numbers = #tpu.dot_dimension_numbers<[1], [0], [0], [1], [0, 0, 1, 1], [], []>} : vector<1x8xf32>, vector<8x8xf32>, vector<1x8xf32> -> vector<1x8xf32>
    %c0_10 = arith.constant 0 : index
    %c0_11 = arith.constant 0 : index
    %9 = vector.load %arg4[%c0_10, %c0_11] : memref<1x8xf32, #tpu.memory_space<vmem>>, vector<1x8xf32>
    %10 = arith.addf %8, %9 : vector<1x8xf32>
    %cst_12 = arith.constant dense<0.000000e+00> : vector<1xf32>
    %11 = vector.multi_reduction <add>, %6, %cst_12 [1] : vector<1x8xf32> to vector<1xf32>
    %12 = vector.shape_cast %11 : vector<1xf32> to vector<1x1xf32>
    %cst_13 = arith.constant dense<0.000000e+00> : vector<1xf32>
    %13 = vector.multi_reduction <add>, %10, %cst_13 [1] : vector<1x8xf32> to vector<1xf32>
    %14 = vector.shape_cast %13 : vector<1xf32> to vector<1x1xf32>
    %15 = vector.broadcast %12 : vector<1x1xf32> to vector<1x8xf32>
    %16 = arith.mulf %15, %10 : vector<1x8xf32>
    %17 = arith.negf %16 : vector<1x8xf32>
    %18 = math.exp %17 : vector<1x8xf32>
    %cst_14 = arith.constant 1.000000e+00 : f32
    %19 = vector.broadcast %cst_14 : f32 to vector<1x8xf32>
    %20 = arith.addf %19, %18 : vector<1x8xf32>
    %21 = arith.divf %19, %20 : vector<1x8xf32>
    %22 = vector.broadcast %14 : vector<1x1xf32> to vector<1x8xf32>
    %23 = arith.mulf %22, %6 : vector<1x8xf32>
    %24 = arith.negf %23 : vector<1x8xf32>
    %25 = math.exp %24 : vector<1x8xf32>
    %cst_15 = arith.constant 1.000000e+00 : f32
    %26 = vector.broadcast %cst_15 : f32 to vector<1x8xf32>
    %27 = arith.addf %26, %25 : vector<1x8xf32>
    %28 = arith.divf %26, %27 : vector<1x8xf32>
    %29 = vector.broadcast %0 : f32 to vector<1x8xf32>
    %30 = arith.mulf %21, %29 : vector<1x8xf32>
    %cst_16 = arith.constant 1.000000e+00 : f32
    %31 = arith.subf %cst_16, %0 : f32
    %32 = vector.broadcast %31 : f32 to vector<1x8xf32>
    %33 = arith.mulf %28, %32 : vector<1x8xf32>
    %34 = arith.addf %30, %33 : vector<1x8xf32>
    %35 = arith.negf %34 : vector<1x8xf32>
    %36 = math.exp %35 : vector<1x8xf32>
    %cst_17 = arith.constant 1.000000e+00 : f32
    %37 = vector.broadcast %cst_17 : f32 to vector<1x8xf32>
    %38 = arith.addf %37, %36 : vector<1x8xf32>
    %39 = arith.divf %37, %38 : vector<1x8xf32>
    %c0_18 = arith.constant 0 : index
    %c0_19 = arith.constant 0 : index
    %c0_20 = arith.constant 0 : index
    %40 = vector.load %arg1[%c0_18, %c0_19, %c0_20] : memref<1x8x256xf32, #tpu.memory_space<vmem>>, vector<1x8x256xf32>
    %41 = vector.shape_cast %39 : vector<1x8xf32> to vector<1x8x1xf32>
    %42 = vector.broadcast %41 : vector<1x8x1xf32> to vector<1x8x256xf32>
    %43 = arith.mulf %40, %42 : vector<1x8x256xf32>
    %c0_21 = arith.constant 0 : index
    %c0_22 = arith.constant 0 : index
    %c0_23 = arith.constant 0 : index
    %44 = vector.load %arg6[%c0_21, %c0_22, %c0_23] : memref<1x8x256xf32, #tpu.memory_space<vmem>>, vector<1x8x256xf32>
    tpu.vector_store %arg6[%c0_21, %c0_22, %c0_23], %43 {strides = array<i32>} : memref<1x8x256xf32, #tpu.memory_space<vmem>>, vector<1x8x256xf32>,
    return
  }
  func.func @transform_0(%arg0: i32) -> (i32, i32, i32) {
    %c0_i32 = arith.constant 0 : i32
    %c0_i32_0 = arith.constant 0 : i32
    %c0_i32_1 = arith.constant 0 : i32
    return %arg0, %c0_i32, %c0_i32_0 : i32, i32, i32
  }
  func.func @transform_1(%arg0: i32) -> (i32, i32) {
    %c0_i32 = arith.constant 0 : i32
    %c0_i32_0 = arith.constant 0 : i32
    %c0_i32_1 = arith.constant 0 : i32
    return %c0_i32, %c0_i32_0 : i32, i32
  }
  func.func @transform_2(%arg0: i32) -> (i32, i32) {
    %c0_i32 = arith.constant 0 : i32
    %c0_i32_0 = arith.constant 0 : i32
    %c0_i32_1 = arith.constant 0 : i32
    return %c0_i32, %c0_i32_0 : i32, i32
  }
  func.func @transform_3(%arg0: i32) -> (i32, i32) {
    %c0_i32 = arith.constant 0 : i32
    %c0_i32_0 = arith.constant 0 : i32
    %c0_i32_1 = arith.constant 0 : i32
    return %c0_i32, %c0_i32_0 : i32, i32
  }
  func.func @transform_4(%arg0: i32) -> i32 {
    %c0_i32 = arith.constant 0 : i32
    %c0_i32_0 = arith.constant 0 : i32
    return %c0_i32 : i32
  }
  func.func @transform_5(%arg0: i32) -> (i32, i32, i32) {
    %c0_i32 = arith.constant 0 : i32
    %c0_i32_0 = arith.constant 0 : i32
    %c0_i32_1 = arith.constant 0 : i32
    return %arg0, %c0_i32, %c0_i32_0 : i32, i32, i32
  }
}

</mosaic_0001>

<bundles_post_ra>
// kernel: tpu_custom_call.1
= control target key start
LH: loop header
LB: loop body
LE: loop exit
PB: predicated region body
PF: predicated region fallthrough
CT: control target
= control target key end

     0   :  { %s1049_s0 = inlined_call_operand.hbm [shape: f32[2,8,256], index: 0, kind: input, shape index: {}]   ;;  %s1050_s1 = inlined_call_operand.hbm [shape: f32[8,8], index: 1, kind: input, shape index: {}]   ;;  %s1051_s2 = inlined_call_operand.vmem [shape: f32[8,8], index: 2, kind: input, shape index: {}]   ;;  %s1052_s3 = inlined_call_operand.vmem [shape: f32[1,8], index: 3, kind: input, shape index: {}]   ;;  %s1053_s4 = inlined_call_operand.<no memory space> [shape: f32[1], index: 4, kind: input, shape index: {}]   ;;  %s1054_s5 = inlined_call_operand.hbm [shape: f32[2,8,256], index: 5, kind: output, shape index: {}]  }
   0x1   :  { %10 = sst [smem:[#allocation2]] %s1053_s4 }
   0x2   :  { %11 = vsyncpa [#allocation4], 0 }
   0x3   :  { %13 = vsyncpa [#allocation4 + $0x1], 0 }
   0x4   :  { %14 = vsyncpa [#allocation7], 0 }
   0x5   :  { %15 = vsyncpa [#allocation5], 0 }
   0x6   :  { %17 = vsyncpa [#allocation5 + $0x1], 0  ;;  %s830_s20 = smov 0   ;;  %s832_s21 = smov 0  }
   0x7   :  { %s834_s22 = smov 0   ;;  %s836_s23 = smov 0  }
   0x8 LB: > { %s851_s4 = sadd.s32 4294967295, %s790_s23   ;;  %s554_s24 = sadd.s32 4294967294, %s790_s23   ;;  %s790_s23 = sphi %s836_s23, %s1078_s23   ;;  %s786_s22 = sphi %s834_s22, %s1077_s22   ;;  %s782_s21 = sphi %s832_s21, %s1076_s21   ;;  %s778_s20 = sphi %s830_s20, %s1075_s20  }
   0x9   : > { %p43_p0 = scmp.ne.s32.totalorder %s782_s21, %s778_s20  ;;  %p1055_p1 = scmp.eq.s32.totalorder %s851_s4, 0 }
   0xa   : > { %p157_p3 = scmp.eq.s32.totalorder %s554_s24, 1  ;;  %p555_p5 = scmp.ge.s32.totalorder %s790_s23, 1 }
   0xb   : > { %p860_p4 = por %p1055_p1, %p43_p0  ;;  %p164_p7 = scmp.lt.s32.totalorder %s790_s23, 3 }
   0xc   : > { %p865_p6 = por %p157_p3, %p43_p0  ;;  %s792_s28 = smov [#allocation6]  }
   0xd   : > { %s1058_s25 = scalar_select %p860_p4, 1, 0 }
   0xe   : > { %s1059_s26 = scalar_select %p865_p6, 1, 0 }
   0xf   : > { %p870_p8 = pnand %p555_p5, %p164_p7  ;;  %s177_s29 = sshll.u32 %s792_s28, 4  ;;  %s178_s29 = int_to_ptr.vmem [resolvable:$true] %s177_s29 }
  0x10   : > { %s878_s30 = sadd.s32 1, %s790_s23   ;;  %s30_s9 = sadd.s32 1, %s786_s22 }
  0x11   : > { %s1060_s27 = scalar_select %p870_p8, 1, 0 }
  0x12   : > { %p599_p10 = pneg %p870_p8  ;;  %s27_s7 = ssub.s32 %s790_s23, %s878_s30 }
  0x13   : > { %p888_p12 = scmp.eq.s32.totalorder %s27_s7, 0  ;;  %s662_s12 = scalar_lea.hbm %s1050_s1, 128 }
  0x14   : > { %p882_p11 = pnand %p599_p10, %p1055_p1  ;;  %p663_p0 = scmp.ne.s32.totalorder %s1050_s1, %s662_s12 }
  0x15   : > { %s1062_s8 = scalar_select %p888_p12, 1, 0 }
  0x16   : > { %p664_p3 = pneg %p882_p11  ;;  %p669_p10 = scmp.lt.u32.totalorder %s662_s12, %s1050_s1 }
  0x18   : > { %p665_p5 = pnand %p664_p3, %p663_p0 }
  0x1a   : > { %p666_p7 = pneg %p665_p5 }
  0x1c   : > { %p671_p9 = pnand %p669_p10, %p666_p7 }
  0x1e   : > { %674 = shalt.err (!%p671_p9)
}
  0x1f   : > { %s675_s17 = scalar_lea.vmem %s178_s29, 128  ;;  %p683_p6 = scmp.lt.s32.totalorder %s178_s29, %s178_s29 }
  0x20   : > { %p676_p1 = scmp.ne.s32.totalorder %s178_s29, %s675_s17  ;;  %p684_p4 = scmp.lt.s32.totalorder %s675_s17, %s675_s17 }
  0x22   : > { %p678_p2 = pnand %p676_p1, %p664_p3  ;;  %p685_p8 = por %p684_p4, %p683_p6 }
  0x24   : > { %p679_p13 = pneg %p678_p2 }
  0x26   : > { %p686_p12 = pnand %p685_p8, %p679_p13 }
  0x28   : > { %689 = shalt.err (!%p686_p12)
}
  0x29   : > { %602 = dma.hbm_to_vmem [thread:$0]  (!%p882_p11), %s1050_s1, 128, %s178_s29, [#allocation7]  }
  0x2a   : > { %p1063_p1 = scmp.ne.s32.totalorder %s1062_s8, 0  ;;  %p38_p2 = scmp.eq.s32.totalorder %s790_s23, 0 }
  0x2b   : > { %p1064_p4 = scmp.ne.s32.totalorder %s786_s22, %s782_s21  ;;  %p1065_p6 = scmp.eq.s32.totalorder %s851_s4, 1 }
  0x2c   : > { %s914_s24 = scalar_select %p1063_p1, %s786_s22, %s30_s9  }
  0x2d   : > { %p922_p8 = por %p1065_p6, %p1064_p4  ;;  %p612_p9 = scmp.lt.s32.totalorder %s790_s23, 2 }
  0x2e   : > { %s197_s6 = sand.u32 1, %s786_s22   ;;  %p1067_p12 = pmov %p1064_p4 }
  0x2f   : > { %s558_s7 = sshll.u32 %s197_s6, 4  ;;  %s575_s10 = sshll.u32 %s790_s23, 8 }
  0x30   : > { %p39_p13 = por %p38_p2, %p1067_p12  ;;  %s935_s29 = scalar_lea.hbm %s1049_s0, %s575_s10 }
  0x31   : > { %s201_s8 = scalar_lea.vmem [#allocation3], %s558_s7  ;;  %s198_s14 = scalar_lea.sflag [#allocation4], %s197_s6 }
  0x32   : > { %s209_s9 = sshll.u32 %s201_s8, 4  ;;  %p937_p11 = pnand %p612_p9, %p39_p13  ;;  %s941_s9 = int_to_ptr.vmem [resolvable:$true] %s209_s9 }
  0x33   : > { %s690_s15 = scalar_lea.hbm %s935_s29, 256  ;;  %s695_s18 = scalar_lea.hbm %s1049_s0, 512 }
  0x34   : > { %p691_p0 = scmp.ne.s32.totalorder %s935_s29, %s690_s15  ;;  %p692_p3 = pneg %p937_p11 }
  0x35   : > { %p696_p10 = scmp.lt.u32.totalorder %s935_s29, %s1049_s0  ;;  %p697_p1 = scmp.lt.u32.totalorder %s695_s18, %s690_s15 }
  0x36   : > { %p693_p5 = pnand %p692_p3, %p691_p0  ;;  %p699_p4 = scmp.lt.u32.totalorder %s690_s15, %s935_s29 }
  0x37   : > { %p698_p2 = por %p697_p1, %p696_p10 }
  0x38   : > { %p694_p7 = pneg %p693_p5 }
  0x39   : > { %p700_p6 = por %p699_p4, %p698_p2 }
  0x3b   : > { %p701_p9 = pnand %p700_p6, %p694_p7 }
  0x3d   : > { %704 = shalt.err (!%p701_p9)
}
  0x3e   : > { %s705_s6 = scalar_lea.vmem %s941_s9, 256  ;;  %s793_s10 = smov [#allocation3]  }
  0x3f   : > { %p706_p12 = scmp.ne.s32.totalorder %s941_s9, %s705_s6  ;;  %s710_s11 = sshll.u32 %s793_s10, 4  ;;  %s711_s11 = int_to_ptr.vmem [resolvable:$false] %s710_s11 }
  0x40   : > { %s712_s12 = scalar_lea.vmem %s711_s11, 512  ;;  %p713_p5 = scmp.lt.s32.totalorder %s941_s9, %s711_s11 }
  0x41   : > { %p708_p13 = pnand %p706_p12, %p692_p3  ;;  %p714_p10 = scmp.lt.s32.totalorder %s712_s12, %s705_s6 }
  0x43   : > { %p709_p0 = pneg %p708_p13  ;;  %p715_p1 = por %p714_p10, %p713_p5 }
  0x45   : > { %p716_p2 = pnand %p715_p1, %p709_p0 }
  0x47   : > { %719 = shalt.err (!%p716_p2)
}
  0x48   : > { %606 = dma.hbm_to_vmem [thread:$0]  (!%p937_p11), %s935_s29, 256, %s941_s9, %s198_s14  }
  0x49   : > { %p1069_p7 = scmp.ne.s32.totalorder %s1060_s27, 0 }
  0x4a   : > { %s971_s8 = sand.u32 (!%p1069_p7), 1, %s782_s21   ;;  %p1070_p3 = scmp.ne.s32.totalorder (!%p1069_p7), %s1058_s25, 0 }
  0x4b   : > { %218 = sbr.rel (%p1069_p7) target bundleno = 783 (0x30f), region = 40  ;;  %s562_s15 = sshll.u32 (!%p1069_p7), %s971_s8, 4 }
  0x4c   : > { %s221_s16 = scalar_lea.sflag (!%p1069_p7), [#allocation4], %s971_s8  ;;  %s224_s17 = scalar_lea.vmem (!%p1069_p7), [#allocation3], %s562_s15 }
  0x52   : > { %765 = dma.done.wait (%p1070_p3), %s221_s16, 256  }
  0x53   : > { %767 = vsyncadd (%p1070_p3), %s221_s16, 4294967040  ;;  %p1071_p11 = scmp.eq.s32.totalorder %s851_s4, 0 }
  0x55   : > { %769 = dma.done.wait (%p1071_p11), [#allocation7], 128   ;;  %p1072_p4 = pmov %p1071_p11 }
  0x56   : > { %v985_v0 = vld [vmem:[%s224_s17] sm:$0xff]  ;;  %v987_v1 = vld [vmem:[%s224_s17 + $0x8] sm:$0xff]  ;;  %v794_v3 = vmov 0.0   ;;  %vm795_vm0 = vmmov 0   ;;  %v264_v6 = vlaneseq  ;;  %vm270_vm1 = vcmask 64512   ;;  %s255_s13 = sld [smem:[#allocation2]] }
  0x57   : > { %771 = vsyncadd (%p1072_p4), [#allocation7], 4294967168  ;;  %v258_v2 = vadd.f32 %v987_v1, %v985_v0  ;;  %581 = vmatprep.subr.mxu0 %v794_v3  ;;  %586 = vmatprep.subr.mxu1 %v794_v3  ;;  %v262_v4 = vld [vmem:[#allocation6] sm:$0xff]  ;;  %vm415_vm2 = vcmask 57344   ;;  %s576_s18 = sshll.u32 %s851_s4, 8  ;;  %s254_s19 = scalar_lea.vmem [#allocation8], %s562_s15 }
  0x58   : > { %v343_v5 = vld [vmem:[%s1051_s2] sm:$0xff]  ;;  %582 = vmatpush3.msra.mxu0 %v262_v4  ;;  %583 = vmatprep.mubr.msk.f32.mxu0 %vm795_vm0, %v794_v3  ;;  %v265_v7 = vand.u32 127, %v264_v6  ;;  %v267_v8 = vshrl.u32 %v264_v6, 7  ;;  %s474_s7 = sshll.u32 %s254_s19, 4  ;;  %s1005_s11 = scalar_lea.hbm %s1054_s5, %s576_s18  ;;  %s1007_s7 = int_to_ptr.vmem [resolvable:$true] %s474_s7 }
  0x59   : > { %259 = vadd.xlane.f32.xlu0 %v258_v2  ;;  %587 = vmatpush3.msra.mxu1 %v343_v5  ;;  %v344_v13 = vld [vmem:[%s1052_s3] sm:$0x1]  ;;  %s460_s4 = scalar_lea.sflag [#allocation5], %s971_s8  ;;  %s720_s12 = scalar_lea.vmem %s1007_s7, 256 }
  0x5a   : > { %588 = vmatprep.mubr.msk.f32.mxu1 %vm795_vm0, %v794_v3  ;;  %v268_v9 = vsub.s32 %v265_v7, %v267_v8  ;;  %v450_v41 = vsub.s32 0, %v267_v8  ;;  %p721_p6 = scmp.ne.s32.totalorder %s1007_s7, %s720_s12  ;;  %s796_s15 = smov [#allocation8]  }
  0x5b   : > { %s724_s16 = sshll.u32 %s796_s15, 4  ;;  %s725_s16 = int_to_ptr.vmem [resolvable:$false] %s724_s16 }
  0x5c   : > { %s438_s14 = ssub.f32 1.0, %s255_s13  ;;  %v436_v32 = vstv %s255_s13  ;;  %p722_p9 = pnand %p721_p6, %p922_p8 }
  0x5d   : > { %s726_s17 = scalar_lea.vmem %s725_s16, 512  ;;  %p727_p13 = scmp.lt.s32.totalorder %s1007_s7, %s725_s16 }
  0x5e   : > { %v439_v33 = vstv %s438_s14  ;;  %p723_p12 = pneg %p722_p9  ;;  %p728_p0 = scmp.lt.s32.totalorder %s726_s17, %s720_s12 }
  0x60   : > { %p729_p5 = por %p728_p0, %p727_p13 }
  0x62   : > { %p730_p10 = pnand %p729_p5, %p723_p12 }
  0xe6   : > { %v260_v10 = vpop.xlane.xlu0 %259 }
  0xe7   : > { %v261_v11 = vmul.f32 0.00390625, %v260_v10 }
  0xe9   : > { %v269_v12 = vrot.slane %v261_v11, %v268_v9 }
  0xeb   : > { %584 = vmatmul.mubr.msk.f32.vlgmr.msra.gmra.mrb[0].mxu0 %vm270_vm1, %v269_v12  ;;  %589 = vmatmul.mubr.msk.f32.vlgmr.msra.gmra.mrb[0].mxu1 %vm270_vm1, %v269_v12 }
 0x1be   : > { %v339_v14 = vpop.f32.mrb[0].mxu0  ;;  %v411_v15 = vpop.f32.mrb[0].mxu1 }
 0x1bf   : > { %v412_v16 = vadd.f32 %v411_v15, %v344_v13  ;;  %v585_v17 = vpop.f32.mrb[1].mxu0  ;;  %v590_v18 = vpop.f32.mrb[1].mxu1  ;;  %v416_v19 = vsel %vm415_vm2, %v339_v14, 0.0 }
 0x1c0   : > { %417 = vadd.xlane.f32.xlu0 %v416_v19 }
 0x1c1   : > { %v419_v20 = vsel %vm415_vm2, %v412_v16, 0.0 }
 0x1c2   : > { %420 = vadd.xlane.f32.xlu1 %v419_v20 }
 0x24d   : > { %v418_v21 = vpop.xlane.xlu0 %417 }
 0x24e   : > { %v422_v22 = vmul.f32 %v418_v21, %v412_v16 }
 0x24f   : > { %v421_v23 = vpop.xlane.xlu1 %420 }
 0x250   : > { %v567_v24 = vmul.f32 -1.442695, %v422_v22  ;;  %v429_v25 = vmul.f32 %v421_v23, %v339_v14 }
 0x252   : > { %650 = vpow2.f32 %v567_v24  ;;  %v568_v26 = vmul.f32 -1.442695, %v429_v25 }
 0x254   : > { %652 = vpow2.f32 %v568_v26 }
 0x25c   : > { %v651_v27 = vpop.eup %650 }
 0x25d   : > { %v426_v28 = vadd.f32 1.0, %v651_v27 }
 0x25e   : > { %v653_v29 = vpop.eup %652 }
 0x25f   : > { %654 = vrcp.f32 %v426_v28  ;;  %v433_v30 = vadd.f32 1.0, %v653_v29 }
 0x261   : > { %656 = vrcp.f32 %v433_v30 }
 0x269   : > { %v655_v31 = vpop.eup %654 }
 0x26a   : > { %v437_v35 = vmul.f32 %v655_v31, %v436_v32 }
 0x26b   : > { %v657_v34 = vpop.eup %656 }
 0x26c   : > { %v440_v36 = vmul.f32 %v657_v34, %v439_v33 }
 0x26e   : > { %v441_v37 = vadd.f32 %v440_v36, %v437_v35 }
 0x270   : > { %v569_v38 = vmul.f32 -1.442695, %v441_v37 }
 0x272   : > { %658 = vpow2.f32 %v569_v38 }
 0x27c   : > { %v659_v39 = vpop.eup %658 }
 0x27d   : > { %v445_v40 = vadd.f32 1.0, %v659_v39 }
 0x27f   : > { %660 = vrcp.f32 %v445_v40 }
 0x289   : > { %v661_v42 = vpop.eup %660 }
 0x28a   : > { %v451_v43 = vrot.slane %v661_v42, %v450_v41 }
 0x28c   : > { %453 = vbcast.lane.b32.xlu1 %v451_v43, 256 }
 0x2fe   : > { %v454_v44 = vpop.permute.xlu1 %453 }
 0x2ff   : > { %v455_v45 = vmul.f32 %v454_v44, %v985_v0  ;;  %v456_v46 = vmul.f32 %v454_v44, %v987_v1 }
 0x301   : > { %457 = vst [vmem:[%s254_s19] sm:$0xff] %v455_v45  ;;  %458 = vst [vmem:[%s254_s19 + $0x8] sm:$0xff] %v456_v46 }
 0x302   : > { %733 = shalt.err (!%p730_p10)
}
 0x303   : > { %s734_s8 = scalar_lea.hbm %s1005_s11, 256  ;;  %s738_s29 = scalar_lea.hbm %s1054_s5, 512 }
 0x304   : > { %p735_p1 = scmp.ne.s32.totalorder %s1005_s11, %s734_s8  ;;  %p739_p3 = scmp.lt.u32.totalorder %s1005_s11, %s1054_s5 }
 0x305   : > { %p740_p11 = scmp.lt.u32.totalorder %s738_s29, %s734_s8  ;;  %p742_p6 = scmp.lt.u32.totalorder %s734_s8, %s1005_s11 }
 0x306   : > { %p736_p2 = pnand %p735_p1, %p922_p8 }
 0x307   : > { %p741_p4 = por %p740_p11, %p739_p3 }
 0x308   : > { %p737_p7 = pneg %p736_p2 }
 0x309   : > { %p743_p9 = por %p742_p6, %p741_p4 }
 0x30b   : > { %p744_p12 = pnand %p743_p9, %p737_p7 }
 0x30d   : > { %747 = shalt.err (!%p744_p12)
}
 0x30e   : > { %597 = dma.vmem_to_hbm [thread:$0]  (%p922_p8), %s1007_s7, 256, %s1005_s11, %s460_s4  }
 0x30f PF: > { %s486_s14 = sand.u32 1, %s778_s20   ;;  %p1073_p13 = scmp.ne.s32.totalorder %s1059_s26, 0 }
 0x310   : > { %p1074_p0 = scmp.ge.s32.totalorder %s790_s23, 2  ;;  %s487_s18 = scalar_lea.sflag [#allocation5], %s486_s14 }
 0x312   : > { %p608_p5 = pnand %p1074_p0, %p1073_p13 }
 0x314   : > { %773 = dma.done.wait (!%p608_p5), %s487_s18, 256  }
 0x315   : > { %775 = vsyncadd (!%p608_p5), %s487_s18, 4294967040  ;;  %p20_p10 = scmp.ge.s32.totalorder %s878_s30, 4   ;;  %s1075_s20 = smov %s782_s21 }
 0x316   : > { %s1076_s21 = smov %s786_s22  ;;  %s1077_s22 = smov %s914_s24 }
 0x317   : > { %s1078_s23 = smov %s878_s30  ;;  %22 = sbr.rel (!%p20_p10) target bundleno = 8 (0x8), region = 89 }
 0x31e   :  { %492 = vsyncpa [#allocation4], 1 }
 0x31f   :  { %494 = vsyncpa [#allocation4 + $0x1], 1 }
 0x320   :  { %495 = vsyncpa [#allocation7], 1 }
 0x321   :  { %496 = vsyncpa [#allocation5], 1 }
 0x322   :  { %498 = vsyncpa [#allocation5 + $0x1], 1 }

</bundles_post_ra>
